<compile_context>
chip_gen: v6e
topology: v6e:2x2x1
jax: 0.10.0
libtpu: 0.0.40
codegen_flags: <defaults>
</compile_context>

<pallas_src>
import jax
import jax.numpy as jnp
from jax.experimental import pallas as pl
from jax.experimental.pallas import tpu as pltpu

LATENT = 32
H1 = 64
H2 = 128
OUT = 256
MAX_TILE_B = 1024  # batch tile (rows); multiple of 16 for bf16 packing


def _decoder_kernel(z_ref, w1_ref, b1_ref, w2_ref, b2_ref, w3_ref, b3_ref,
                    out_ref):
    # Layer 1: Linear + ReLU   (bf16 x bf16 -> f32 accumulate on the MXU)
    h = jnp.dot(z_ref[...], w1_ref[...], preferred_element_type=jnp.float32)
    h = jnp.maximum(h + b1_ref[...], 0.0)
    # Layer 2: Linear + ReLU
    h = jnp.dot(h.astype(jnp.bfloat16), w2_ref[...],
                preferred_element_type=jnp.float32)
    h = jnp.maximum(h + b2_ref[...], 0.0)
    # Layer 3: Linear + Sigmoid (elementwise math stays f32 — v5e friendly;
    # sigmoid's exp/recip run on the EUP slot, effectively free here).
    h = jnp.dot(h.astype(jnp.bfloat16), w3_ref[...],
                preferred_element_type=jnp.float32)
    out_ref[...] = jax.nn.sigmoid(h + b3_ref[...]).astype(out_ref.dtype)


def _pick_tile_b(B: int) -> int:
    # Target up to MAX_TILE_B-row tiles; for smaller batches split into >=2
    # tiles when possible so the "parallel" batch axis shards across both
    # v7x TensorCores. Rounded up to 16 rows (bf16 sublane packing for z).
    half = -(-B // 2)                       # cdiv(B, 2)
    tb = ((half + 15) // 16) * 16
    return max(16, min(MAX_TILE_B, tb))


@jax.jit
def decoder_forward(z, w1, b1, w2, b2, w3, b3):
    B = z.shape[0]
    tile_b = _pick_tile_b(B)                # static (shape-derived) Python int
    n_tiles = pl.cdiv(B, tile_b)
    Bp = n_tiles * tile_b

    # MXU-facing operands in bf16; biases stay f32.
    zb = z.astype(jnp.bfloat16)
    if Bp != B:
        zb = jnp.pad(zb, ((0, Bp - B), (0, 0)))
    w1b = w1.astype(jnp.bfloat16)
    w2b = w2.astype(jnp.bfloat16)
    w3b = w3.astype(jnp.bfloat16)

    def const_spec(shape):
        # Full-array block, constant index_map: fetched once, stays in VMEM.
        return pl.BlockSpec(shape, lambda i: (0, 0))

    out = pl.pallas_call(
        _decoder_kernel,
        out_shape=jax.ShapeDtypeStruct((Bp, OUT), jnp.float32),
        grid_spec=pltpu.PrefetchScalarGridSpec(
            num_scalar_prefetch=0,
            grid=(n_tiles,),
            in_specs=[
                pl.BlockSpec((tile_b, LATENT), lambda i: (i, 0)),  # z (streams)
                const_spec((LATENT, H1)),   # w1
                const_spec((1, H1)),        # b1
                const_spec((H1, H2)),       # w2
                const_spec((1, H2)),        # b2
                const_spec((H2, OUT)),      # w3
                const_spec((1, OUT)),       # b3
            ],
            out_specs=pl.BlockSpec((tile_b, OUT), lambda i: (i, 0)),
        ),
        compiler_params=pltpu.CompilerParams(
            dimension_semantics=("parallel",)),
    )(zb, w1b, b1, w2b, b2, w3b, b3)

    return out[:B]


def _init_linear(key, fan_in, fan_out):
    """Mimic torch.nn.Linear default init (uniform +-1/sqrt(fan_in))."""
    kw, kb = jax.random.split(key)
    bound = 1.0 / (fan_in ** 0.5)
    # Stored as (fan_in, fan_out) so forward is z @ W + b (== PyTorch z @ W.T).
    w = jax.random.uniform(kw, (fan_in, fan_out), jnp.float32, -bound, bound)
    b = jax.random.uniform(kb, (1, fan_out), jnp.float32, -bound, bound)
    return w, b


def _reference_f32(z, w1, b1, w2, b2, w3, b3):
    h = jnp.maximum(z @ w1 + b1, 0.0)
    h = jnp.maximum(h @ w2 + b2, 0.0)
    return jax.nn.sigmoid(h @ w3 + b3)


def _reference_mixed(z, w1, b1, w2, b2, w3, b3):
    # Mirrors the kernel's bf16-MXU / f32-elementwise precision exactly.
    bf = jnp.bfloat16
    h = jnp.dot(z.astype(bf), w1.astype(bf), preferred_element_type=jnp.float32)
    h = jnp.maximum(h + b1, 0.0)
    h = jnp.dot(h.astype(bf), w2.astype(bf), preferred_element_type=jnp.float32)
    h = jnp.maximum(h + b2, 0.0)
    h = jnp.dot(h.astype(bf), w3.astype(bf), preferred_element_type=jnp.float32)
    return jax.nn.sigmoid(h + b3)


if __name__ == "__main__":
    key = jax.random.PRNGKey(0)
    kz, k1, k2, k3 = jax.random.split(key, 4)

    B = 64  # small test batch; wrapper splits it into 2 parallel 32-row tiles
    z = jax.random.normal(kz, (B, LATENT), jnp.float32)
    w1, b1 = _init_linear(k1, LATENT, H1)
    w2, b2 = _init_linear(k2, H1, H2)
    w3, b3 = _init_linear(k3, H2, OUT)

    out = decoder_forward(z, w1, b1, w2, b2, w3, b3)
    out = jax.block_until_ready(out)
    assert out.shape == (B, OUT), out.shape

    # Tight check vs. a reference with matching mixed precision.
    ref_mixed = _reference_mixed(z, w1, b1, w2, b2, w3, b3)
    assert jnp.allclose(out, ref_mixed, atol=2e-3, rtol=2e-3), float(
        jnp.max(jnp.abs(out - ref_mixed)))

    # Looser sanity check vs. the pure-f32 PyTorch-equivalent forward.
    ref_f32 = _reference_f32(z, w1, b1, w2, b2, w3, b3)
    assert jnp.allclose(out, ref_f32, atol=2e-2, rtol=2e-2), float(
        jnp.max(jnp.abs(out - ref_f32)))

    # Exercise a ragged batch to cover the pad+slice path.
    zr = jax.random.normal(kz, (37, LATENT), jnp.float32)
    outr = jax.block_until_ready(decoder_forward(zr, w1, b1, w2, b2, w3, b3))
    assert outr.shape == (37, OUT), outr.shape
    refr = _reference_mixed(zr, w1, b1, w2, b2, w3, b3)
    assert jnp.allclose(outr, refr, atol=2e-3, rtol=2e-3)

    print("KERNEL_OK")
</pallas_src>

<mosaic_0001>
module attributes {stable_mosaic.version = 11 : i64} {
  func.func @_decoder_kernel(%arg0: i32, %arg1: memref<32x32xbf16, #tpu.memory_space<vmem>>, %arg2: memref<32x64xbf16, #tpu.memory_space<vmem>>, %arg3: memref<1x64xf32, #tpu.memory_space<vmem>>, %arg4: memref<64x128xbf16, #tpu.memory_space<vmem>>, %arg5: memref<1x128xf32, #tpu.memory_space<vmem>>, %arg6: memref<128x256xbf16, #tpu.memory_space<vmem>>, %arg7: memref<1x256xf32, #tpu.memory_space<vmem>>, %arg8: memref<32x256xf32, #tpu.memory_space<vmem>>) attributes {dimension_semantics = [#tpu.dimension_semantics<parallel>], iteration_bounds = array<i64: 2>, scalar_prefetch = 0 : i64, scratch_operands = 0 : i64, tpu.core_type = #tpu.core_type<tc>, window_params = [{transform_indices = @transform_0, window_bounds = array<i64: 32, 32>}, {pipeline_mode = #tpu.pipeline_mode<synchronous>, transform_indices = @transform_1, window_bounds = array<i64: 32, 64>}, {pipeline_mode = #tpu.pipeline_mode<synchronous>, transform_indices = @transform_2, window_bounds = array<i64: 1, 64>}, {pipeline_mode = #tpu.pipeline_mode<synchronous>, transform_indices = @transform_3, window_bounds = array<i64: 64, 128>}, {pipeline_mode = #tpu.pipeline_mode<synchronous>, transform_indices = @transform_4, window_bounds = array<i64: 1, 128>}, {pipeline_mode = #tpu.pipeline_mode<synchronous>, transform_indices = @transform_5, window_bounds = array<i64: 128, 256>}, {pipeline_mode = #tpu.pipeline_mode<synchronous>, transform_indices = @transform_6, window_bounds = array<i64: 1, 256>}, {transform_indices = @transform_7, window_bounds = array<i64: 32, 256>}]} {
    %c0 = arith.constant 0 : index
    %c0_0 = arith.constant 0 : index
    %0 = vector.load %arg1[%c0, %c0_0] : memref<32x32xbf16, #tpu.memory_space<vmem>>, vector<32x32xbf16>
    %c0_1 = arith.constant 0 : index
    %c0_2 = arith.constant 0 : index
    %1 = vector.load %arg2[%c0_1, %c0_2] : memref<32x64xbf16, #tpu.memory_space<vmem>>, vector<32x64xbf16>
    %cst = arith.constant dense<0.000000e+00> : vector<32x64xf32>
    %2 = tpu.matmul %0, %1, %cst {dimension_numbers = #tpu.dot_dimension_numbers<[1], [0], [0], [1], [0, 0, 1, 1], [], []>} : vector<32x32xbf16>, vector<32x64xbf16>, vector<32x64xf32> -> vector<32x64xf32>
    %c0_3 = arith.constant 0 : index
    %c0_4 = arith.constant 0 : index
    %3 = vector.load %arg3[%c0_3, %c0_4] : memref<1x64xf32, #tpu.memory_space<vmem>>, vector<1x64xf32>
    %4 = vector.broadcast %3 : vector<1x64xf32> to vector<32x64xf32>
    %5 = arith.addf %2, %4 : vector<32x64xf32>
    %cst_5 = arith.constant 0.000000e+00 : f32
    %6 = vector.broadcast %cst_5 : f32 to vector<32x64xf32>
    %7 = arith.maximumf %5, %6 : vector<32x64xf32>
    %8 = arith.truncf %7 : vector<32x64xf32> to vector<32x64xbf16>
    %c0_6 = arith.constant 0 : index
    %c0_7 = arith.constant 0 : index
    %9 = vector.load %arg4[%c0_6, %c0_7] : memref<64x128xbf16, #tpu.memory_space<vmem>>, vector<64x128xbf16>
    %cst_8 = arith.constant dense<0.000000e+00> : vector<32x128xf32>
    %10 = tpu.matmul %8, %9, %cst_8 {dimension_numbers = #tpu.dot_dimension_numbers<[1], [0], [0], [1], [0, 0, 1, 1], [], []>} : vector<32x64xbf16>, vector<64x128xbf16>, vector<32x128xf32> -> vector<32x128xf32>
    %c0_9 = arith.constant 0 : index
    %c0_10 = arith.constant 0 : index
    %11 = vector.load %arg5[%c0_9, %c0_10] : memref<1x128xf32, #tpu.memory_space<vmem>>, vector<1x128xf32>
    %12 = vector.broadcast %11 : vector<1x128xf32> to vector<32x128xf32>
    %13 = arith.addf %10, %12 : vector<32x128xf32>
    %cst_11 = arith.constant 0.000000e+00 : f32
    %14 = vector.broadcast %cst_11 : f32 to vector<32x128xf32>
    %15 = arith.maximumf %13, %14 : vector<32x128xf32>
    %16 = arith.truncf %15 : vector<32x128xf32> to vector<32x128xbf16>
    %c0_12 = arith.constant 0 : index
    %c0_13 = arith.constant 0 : index
    %17 = vector.load %arg6[%c0_12, %c0_13] : memref<128x256xbf16, #tpu.memory_space<vmem>>, vector<128x256xbf16>
    %cst_14 = arith.constant dense<0.000000e+00> : vector<32x256xf32>
    %18 = tpu.matmul %16, %17, %cst_14 {dimension_numbers = #tpu.dot_dimension_numbers<[1], [0], [0], [1], [0, 0, 1, 1], [], []>} : vector<32x128xbf16>, vector<128x256xbf16>, vector<32x256xf32> -> vector<32x256xf32>
    %c0_15 = arith.constant 0 : index
    %c0_16 = arith.constant 0 : index
    %19 = vector.load %arg7[%c0_15, %c0_16] : memref<1x256xf32, #tpu.memory_space<vmem>>, vector<1x256xf32>
    %20 = vector.broadcast %19 : vector<1x256xf32> to vector<32x256xf32>
    %21 = arith.addf %18, %20 : vector<32x256xf32>
    %22 = arith.negf %21 : vector<32x256xf32>
    %23 = math.exp %22 : vector<32x256xf32>
    %cst_17 = arith.constant 1.000000e+00 : f32
    %24 = vector.broadcast %cst_17 : f32 to vector<32x256xf32>
    %25 = arith.addf %24, %23 : vector<32x256xf32>
    %26 = arith.divf %24, %25 : vector<32x256xf32>
    %c0_18 = arith.constant 0 : index
    %c0_19 = arith.constant 0 : index
    %27 = vector.load %arg8[%c0_18, %c0_19] : memref<32x256xf32, #tpu.memory_space<vmem>>, vector<32x256xf32>
    tpu.vector_store %arg8[%c0_18, %c0_19], %26 {strides = array<i32>} : memref<32x256xf32, #tpu.memory_space<vmem>>, vector<32x256xf32>,
    return
  }
  func.func @transform_0(%arg0: i32) -> (i32, i32) {
    %c0_i32 = arith.constant 0 : i32
    %c0_i32_0 = arith.constant 0 : i32
    return %arg0, %c0_i32 : i32, i32
  }
  func.func @transform_1(%arg0: i32) -> (i32, i32) {
    %c0_i32 = arith.constant 0 : i32
    %c0_i32_0 = arith.constant 0 : i32
    %c0_i32_1 = arith.constant 0 : i32
    return %c0_i32, %c0_i32_0 : i32, i32
  }
  func.func @transform_2(%arg0: i32) -> (i32, i32) {
    %c0_i32 = arith.constant 0 : i32
    %c0_i32_0 = arith.constant 0 : i32
    %c0_i32_1 = arith.constant 0 : i32
    return %c0_i32, %c0_i32_0 : i32, i32
  }
  func.func @transform_3(%arg0: i32) -> (i32, i32) {
    %c0_i32 = arith.constant 0 : i32
    %c0_i32_0 = arith.constant 0 : i32
    %c0_i32_1 = arith.constant 0 : i32
    return %c0_i32, %c0_i32_0 : i32, i32
  }
  func.func @transform_4(%arg0: i32) -> (i32, i32) {
    %c0_i32 = arith.constant 0 : i32
    %c0_i32_0 = arith.constant 0 : i32
    %c0_i32_1 = arith.constant 0 : i32
    return %c0_i32, %c0_i32_0 : i32, i32
  }
  func.func @transform_5(%arg0: i32) -> (i32, i32) {
    %c0_i32 = arith.constant 0 : i32
    %c0_i32_0 = arith.constant 0 : i32
    %c0_i32_1 = arith.constant 0 : i32
    return %c0_i32, %c0_i32_0 : i32, i32
  }
  func.func @transform_6(%arg0: i32) -> (i32, i32) {
    %c0_i32 = arith.constant 0 : i32
    %c0_i32_0 = arith.constant 0 : i32
    %c0_i32_1 = arith.constant 0 : i32
    return %c0_i32, %c0_i32_0 : i32, i32
  }
  func.func @transform_7(%arg0: i32) -> (i32, i32) {
    %c0_i32 = arith.constant 0 : i32
    %c0_i32_0 = arith.constant 0 : i32
    return %arg0, %c0_i32 : i32, i32
  }
}

</mosaic_0001>

<bundles_post_ra>
// kernel: decoder_forward.1
= control target key start
LH: loop header
LB: loop body
LE: loop exit
PB: predicated region body
PF: predicated region fallthrough
CT: control target
= control target key end

     0   :  { %12 = vsyncpa [#allocation3], 0  ;;  %s1250_s0 = inlined_call_operand.vmem [shape: bf16[64,32], index: 0, kind: input, shape index: {}]   ;;  %s1251_s1 = inlined_call_operand.vmem [shape: bf16[32,64], index: 1, kind: input, shape index: {}]   ;;  %s1252_s2 = inlined_call_operand.vmem [shape: f32[1,64], index: 2, kind: input, shape index: {}]   ;;  %s1253_s3 = inlined_call_operand.vmem [shape: bf16[64,128], index: 3, kind: input, shape index: {}]   ;;  %s1254_s4 = inlined_call_operand.vmem [shape: f32[1,128], index: 4, kind: input, shape index: {}]   ;;  %s1255_s5 = inlined_call_operand.vmem [shape: bf16[128,256], index: 5, kind: input, shape index: {}]   ;;  %s1256_s6 = inlined_call_operand.vmem [shape: f32[1,256], index: 6, kind: input, shape index: {}]   ;;  %s1257_s7 = inlined_call_operand.hbm [shape: f32[64,256], index: 7, kind: output, shape index: {}]  }
   0x1   :  { %14 = vsyncpa [#allocation3 + $0x1], 0  ;;  %s1070_s24 = smov 0   ;;  %s1072_s25 = smov 0  }
   0x2   :  { %s1074_s26 = smov 0   ;;  %s1076_s27 = smov 0  }
   0x3 LB: > { %s1091_s28 = sadd.s32 4294967295, %s1024_s27   ;;  %s775_s29 = sadd.s32 4294967294, %s1024_s27   ;;  %s1024_s27 = sphi %s1076_s27, %s1263_s27   ;;  %s1020_s26 = sphi %s1074_s26, %s1262_s26   ;;  %s1016_s25 = sphi %s1072_s25, %s1261_s25   ;;  %s1012_s24 = sphi %s1070_s24, %s1260_s24  }
   0x4   : > { %s1095_s30 = sadd.s32 1, %s1024_s27   ;;  %s179_s8 = sadd.s32 1, %s1020_s26 }
   0x5   : > { %s176_s9 = ssub.s32 %s1024_s27, %s1095_s30  ;;  %p189_p0 = scmp.ne.s32.totalorder %s1020_s26, %s1016_s25 }
   0x6   : > { %p177_p1 = scmp.eq.s32.totalorder %s176_s9, 0  ;;  %p190_p2 = scmp.eq.s32.totalorder %s1091_s28, 1 }
   0x7   : > { %p195_p3 = scmp.ne.s32.totalorder %s1016_s25, %s1012_s24  ;;  %p196_p4 = scmp.eq.s32.totalorder %s775_s29, 1 }
   0x8   : > { %s1106_s10 = scalar_select %p177_p1, %s1020_s26, %s179_s8  }
   0x9   : > { %p1108_p5 = por %p190_p2, %p189_p0  ;;  %p1112_p6 = por %p196_p4, %p195_p3 }
   0xa   : > { %p778_p7 = scmp.ge.s32.totalorder %s1024_s27, 1  ;;  %p241_p8 = scmp.lt.s32.totalorder %s1024_s27, 3 }
   0xc   : > { %p242_p9 = pnand %p778_p7, %p241_p8 }
   0xd   : > { %s780_s15 = sshll.u32 (!%p242_p9), %s1091_s28, 2  ;;  %s270_s9 = sand.u32 (!%p242_p9), 1, %s1016_s25  }
   0xe   : > { %245 = sbr.rel (%p242_p9) target bundleno = 694 (0x2b6), region = 48  ;;  %p274_p10 = scmp.lt.s32.totalorder (!%p242_p9), %s780_s15, 7 }
   0xf   : > { %s779_s13 = sshll.u32 (!%p242_p9), %s270_s9, 6  ;;  %s1027_s21 = smov (!%p242_p9), [#allocation2]  }
  0x10   : > { %s272_s14 = scalar_lea.vmem (!%p242_p9), [#allocation2], %s779_s13  ;;  %s968_s22 = sshll.u32 (!%p242_p9), %s1027_s21, 4  ;;  %s969_s22 = int_to_ptr.vmem [resolvable:$false] %s968_s22 }
  0x11   : > { %s713_s16 = sshll.u32 (!%p242_p9), %s272_s14, 4  ;;  %s1206_s16 = int_to_ptr.vmem [resolvable:$true] %s713_s16 }
  0x12   : > { %p971_p0 = scmp.lt.s32.totalorder (!%p242_p9), %s1206_s16, %s969_s22 }
  0x13   : > { %v900_v0 = vld [vmem:[%s1251_s1 + $0x8] sm:$0xff]   ;;  %v901_v1 = vld [vmem:[%s1251_s1] sm:$0xff]   ;;  %v904_v2 = vld [vmem:[%s1253_s3 + $0x18] sm:$0xff]   ;;  %s1265_s15 = smov (!%p274_p10, %s780_s15), 7  ;;  %vm318_vm0 = vcmask 261120   ;;  %vm419_vm1 = vcmask 523264   ;;  %v499_v55 = vlaneseq }
  0x14   : > { %838 = vmatprep.subr.bf16.mxu1 %v900_v0  ;;  %s781_s20 = sshll.u32 %s1265_s15, 2  ;;  %v905_v5 = vld [vmem:[%s1253_s3 + $0x10] sm:$0xff]   ;;  %v906_v6 = vld [vmem:[%s1253_s3 + $0x8] sm:$0xff]   ;;  %v907_v7 = vld [vmem:[%s1253_s3] sm:$0xff]   ;;  %v1026_v39 = vmov 0   ;;  %s827_s15 = sshll.u32 %s1091_s28, 10 }
  0x15   : > { %839 = vmatpush3.bf16.msra.mxu1 %v900_v0  ;;  %s277_s23 = scalar_lea.vmem %s1250_s0, %s781_s20  ;;  %v908_v8 = vld [vmem:[%s1255_s5 + $0x74] ss:$8 sps:$4 sm:$0xff]   ;;  %v910_v9 = vld [vmem:[%s1255_s5 + $0x70] ss:$8 sps:$4 sm:$0xff]   ;;  %v911_v10 = vld [vmem:[%s1255_s5 + $0x64] ss:$8 sps:$4 sm:$0xff]   ;;  %621 = vmatprep.mubr.bf16.mxu0 %v1026_v39  ;;  %s1204_s19 = scalar_lea.hbm %s1257_s7, %s827_s15 }
  0x16   : > { %840 = vmatprep.subr.bf16.mxu1 %v901_v1  ;;  %v902_v3 = vld [vmem:[%s277_s23] sm:$0xff]   ;;  %v903_v4 = vld [vmem:[%s277_s23 + $0x8] sm:$0xff]   ;;  %589 = vmatprep.subr.bf16.mxu0 %v908_v8  ;;  %v914_v12 = vld [vmem:[%s1255_s5 + $0x54] ss:$8 sps:$4 sm:$0xff]   ;;  %v500_v56 = vshrl.u32 %v499_v55, 7  ;;  %s1210_s20 = scalar_lea.sflag [#allocation3], %s270_s9 }
  0x17   : > { %842 = vmatprep.mubr.msk.bf16.mxu1 %vm318_vm0, %v902_v3  ;;  %590 = vmatpush1.bf16.msra.mxu0 %v910_v9  ;;  %v913_v11 = vld [vmem:[%s1255_s5 + $0x60] ss:$8 sps:$4 sm:$0xff]   ;;  %v916_v13 = vld [vmem:[%s1255_s5 + $0x50] ss:$8 sps:$4 sm:$0xff]   ;;  %v917_v14 = vld [vmem:[%s1255_s5 + $0x44] ss:$8 sps:$4 sm:$0xff]  }
  0x18   : > { %591 = vmatprep.subr.bf16.mxu0 %v911_v10  ;;  %v919_v15 = vld [vmem:[%s1255_s5 + $0x40] ss:$8 sps:$4 sm:$0xff]   ;;  %v920_v16 = vld [vmem:[%s1255_s5 + $0x34] ss:$8 sps:$4 sm:$0xff]   ;;  %v922_v17 = vld [vmem:[%s1255_s5 + $0x30] ss:$8 sps:$4 sm:$0xff]  }
  0x19   : > { %841 = vmatpush3.bf16.msra.mxu1 %v901_v1  ;;  %v782_v20 = vld [vmem:[%s1252_s2] ss:$0 sm:$0xff]  ;;  %v923_v33 = vld [vmem:[%s1255_s5 + $0x24] ss:$8 sps:$4 sm:$0xff]   ;;  %v926_v35 = vld [vmem:[%s1255_s5 + $0x14] ss:$8 sps:$4 sm:$0xff]  }
  0x1a   : > { %846 = vmatprep.subr.bf16.mxu1 %v904_v2  ;;  %v925_v34 = vld [vmem:[%s1255_s5 + $0x20] ss:$8 sps:$4 sm:$0xff]   ;;  %v928_v36 = vld [vmem:[%s1255_s5 + $0x10] ss:$8 sps:$4 sm:$0xff]   ;;  %v929_v37 = vld [vmem:[%s1255_s5 + $0x4] ss:$8 sps:$4 sm:$0xff]  }
  0x1b   : > { %592 = vmatpush1.bf16.msra.mxu0 %v913_v11  ;;  %v931_v38 = vld [vmem:[%s1255_s5] ss:$8 sps:$4 sm:$0xff]   ;;  %v501_v57 = vsub.s32 0, %v500_v56  ;;  %v505_v59 = vsub.s32 1, %v500_v56  ;;  %s964_s28 = scalar_lea.vmem %s1206_s16, 1024  ;;  %s970_s23 = scalar_lea.vmem %s969_s22, 2048 }
  0x1c   : > { %843 = vmatmul.mubr.msk.bf16.vlgmr.msra.gmra.mxu1 %vm318_vm0, %v903_v4  ;;  %593 = vmatprep.subr.bf16.mxu0 %v914_v12  ;;  %v789_v42 = vld [vmem:[%s1254_s4] ss:$0 sm:$0xff]  ;;  %p965_p11 = scmp.ne.s32.totalorder %s1206_s16, %s964_s28  ;;  %p972_p1 = scmp.lt.s32.totalorder %s970_s23, %s964_s28 }
  0x1d   : > { %847 = vmatpush3.bf16.msra.mxu1 %v904_v2  ;;  %v497_v58 = vld [vmem:[%s1256_s6] sm:$0x3] }
  0x1e   : > { %848 = vmatprep.subr.bf16.mxu1 %v905_v5  ;;  %v502_v60 = vrot.slane %v497_v58, %v501_v57  ;;  %v506_v61 = vrot.slane %v497_v58, %v505_v59  ;;  %p966_p12 = pnand %p965_p11, %p1108_p5  ;;  %p973_p2 = por %p972_p1, %p971_p0 }
  0x1f   : > { %594 = vmatpush1.bf16.msra.mxu0 %v916_v13 }
  0x20   : > { %595 = vmatprep.subr.bf16.mxu0 %v917_v14  ;;  %p967_p13 = pneg %p966_p12 }
  0x21   : > { %849 = vmatpush3.bf16.msra.mxu1 %v905_v5 }
  0x22   : > { %850 = vmatprep.subr.bf16.mxu1 %v906_v6  ;;  %p974_p3 = pnand %p973_p2, %p967_p13 }
  0x23   : > { %596 = vmatpush1.bf16.msra.mxu0 %v919_v15 }
  0x24   : > { %597 = vmatprep.subr.bf16.mxu0 %v920_v16 }
  0x25   : > { %851 = vmatpush3.bf16.msra.mxu1 %v906_v6 }
  0x26   : > { %852 = vmatprep.subr.bf16.mxu1 %v907_v7 }
  0x27   : > { %598 = vmatpush1.bf16.msra.mxu0 %v922_v17 }
  0x28   : > { %599 = vmatprep.subr.bf16.mxu0 %v923_v33 }
  0x29   : > { %853 = vmatpush3.bf16.msra.mxu1 %v907_v7 }
  0x2b   : > { %600 = vmatpush1.bf16.msra.mxu0 %v925_v34 }
  0x2c   : > { %601 = vmatprep.subr.bf16.mxu0 %v926_v35 }
  0x2f   : > { %602 = vmatpush1.bf16.msra.mxu0 %v928_v36 }
  0x30   : > { %603 = vmatprep.subr.bf16.mxu0 %v929_v37 }
  0x33   : > { %604 = vmatpush1.bf16.msra.mxu0 %v931_v38 }
  0xdc   : > { %v844_v18 = vpop.f32.mrf.mxu1 }
  0xdd   : > { %v368_v24 = vadd.f32 %v844_v18, %v782_v20 }
  0xde   : > { %v359_v19 = vpop.f32.mrf.mxu1 }
  0xdf   : > { %v360_v22 = vadd.f32 %v782_v20, %v359_v19  ;;  %v376_v30 = vmax.f32 %v368_v24, 0.0 }
  0xe0   : > { %v845_v21 = vpop.f32.mrf.mxu1 }
  0xe1   : > { %v371_v23 = vadd.f32 %v845_v21, %v782_v20  ;;  %v374_v28 = vmax.f32 %v360_v22, 0.0 }
  0xe2   : > { %v362_v25 = vpop.f32.mrf.mxu1 }
  0xe3   : > { %v363_v26 = vadd.f32 %v782_v20, %v362_v25  ;;  %v377_v27 = vmax.f32 %v371_v23, 0.0 }
  0xe5   : > { %v375_v29 = vmax.f32 %v363_v26, 0.0  ;;  %v379_v32 = vpack.c.bf16 %v377_v27, %v376_v30 }
  0xe7   : > { %v378_v31 = vpack.c.bf16 %v375_v29, %v374_v28 }
  0xe9   : > { %854 = vmatprep.mubr.msk.bf16.mxu1 %vm419_vm1, %v378_v31 }
  0xea   : > { %855 = vmatmul.mubr.msk.bf16.vlgmr.msra.gmra.mxu1 %vm419_vm1, %v379_v32 }
 0x1aa   : > { %v856_v40 = vpop.f32.mrf.mxu1 }
 0x1ab   : > { %v469_v51 = vadd.f32 %v856_v40, %v789_v42 }
 0x1ac   : > { %v460_v41 = vpop.f32.mrf.mxu1 }
 0x1ad   : > { %v461_v44 = vadd.f32 %v789_v42, %v460_v41  ;;  %v477_v53 = vmax.f32 %v469_v51, 0.0 }
 0x1ae   : > { %v857_v43 = vpop.f32.mrf.mxu1 }
 0x1af   : > { %v475_v47 = vmax.f32 %v461_v44, 0.0  ;;  %v472_v49 = vadd.f32 %v857_v43, %v789_v42 }
 0x1b0   : > { %v463_v45 = vpop.f32.mrf.mxu1 }
 0x1b1   : > { %v464_v46 = vadd.f32 %v789_v42, %v463_v45  ;;  %v478_v52 = vmax.f32 %v472_v49, 0.0 }
 0x1b3   : > { %v476_v48 = vmax.f32 %v464_v46, 0.0  ;;  %v480_v54 = vpack.c.bf16 %v478_v52, %v477_v53 }
 0x1b5   : > { %v479_v50 = vpack.c.bf16 %v476_v48, %v475_v47 }
 0x1b7   : > { %622 = vmatmul.mubr.bf16.vlgmr.msra.gmra.mxu0 %v479_v50 }
 0x1b8   : > { %631 = vmatprep.mubr.bf16.mxu0 %v1026_v39 }
 0x1bf   : > { %632 = vmatmul.mubr.bf16.gmra.mxu0 %v480_v54 }
 0x277   : > { %v623_v62 = vpop.f32.mrf.mxu0 }
 0x278   : > { %v624_v63 = vadd.f32 %v623_v62, %v502_v60 }
 0x279   : > { %v625_v0 = vpop.f32.mrf.mxu0 }
 0x27a   : > { %v812_v1 = vmul.f32 -1.442695, %v624_v63  ;;  %v626_v2 = vadd.f32 %v625_v0, %v506_v61 }
 0x27b   : > { %v627_v3 = vpop.f32.mrf.mxu0 }
 0x27c   : > { %932 = vpow2.f32 %v812_v1  ;;  %v813_v4 = vmul.f32 -1.442695, %v626_v2  ;;  %v628_v5 = vadd.f32 %v627_v3, %v502_v60 }
 0x27d   : > { %v629_v6 = vpop.f32.mrf.mxu0 }
 0x27e   : > { %934 = vpow2.f32 %v813_v4  ;;  %v814_v7 = vmul.f32 -1.442695, %v628_v5  ;;  %v630_v8 = vadd.f32 %v629_v6, %v506_v61 }
 0x27f   : > { %v633_v9 = vpop.f32.mrf.mxu0 }
 0x280   : > { %936 = vpow2.f32 %v814_v7  ;;  %v815_v10 = vmul.f32 -1.442695, %v630_v8  ;;  %v634_v11 = vadd.f32 %v633_v9, %v502_v60 }
 0x281   : > { %v635_v12 = vpop.f32.mrf.mxu0 }
 0x282   : > { %938 = vpow2.f32 %v815_v10  ;;  %v816_v13 = vmul.f32 -1.442695, %v634_v11  ;;  %v636_v14 = vadd.f32 %v635_v12, %v506_v61 }
 0x283   : > { %v637_v15 = vpop.f32.mrf.mxu0 }
 0x284   : > { %940 = vpow2.f32 %v816_v13  ;;  %v817_v16 = vmul.f32 -1.442695, %v636_v14  ;;  %v638_v17 = vadd.f32 %v637_v15, %v502_v60 }
 0x285   : > { %v639_v18 = vpop.f32.mrf.mxu0 }
 0x286   : > { %942 = vpow2.f32 %v817_v16  ;;  %v818_v19 = vmul.f32 -1.442695, %v638_v17  ;;  %v640_v20 = vadd.f32 %v639_v18, %v506_v61 }
 0x288   : > { %944 = vpow2.f32 %v818_v19  ;;  %v819_v21 = vmul.f32 -1.442695, %v640_v20 }
 0x289   : > { %v933_v22 = vpop.eup %932 }
 0x28a   : > { %v666_v23 = vadd.f32 1.0, %v933_v22  ;;  %946 = vpow2.f32 %v819_v21 }
 0x28b   : > { %v935_v24 = vpop.eup %934 }
 0x28c   : > { %948 = vrcp.f32 %v666_v23  ;;  %v667_v25 = vadd.f32 1.0, %v935_v24 }
 0x28d   : > { %v937_v26 = vpop.eup %936 }
 0x28e   : > { %950 = vrcp.f32 %v667_v25  ;;  %v668_v27 = vadd.f32 1.0, %v937_v26 }
 0x28f   : > { %v939_v28 = vpop.eup %938 }
 0x290   : > { %952 = vrcp.f32 %v668_v27  ;;  %v669_v29 = vadd.f32 1.0, %v939_v28 }
 0x291   : > { %v941_v30 = vpop.eup %940 }
 0x292   : > { %954 = vrcp.f32 %v669_v29  ;;  %v670_v31 = vadd.f32 1.0, %v941_v30 }
 0x293   : > { %v943_v32 = vpop.eup %942 }
 0x294   : > { %956 = vrcp.f32 %v670_v31  ;;  %v671_v33 = vadd.f32 1.0, %v943_v32 }
 0x295   : > { %v945_v34 = vpop.eup %944 }
 0x296   : > { %958 = vrcp.f32 %v671_v33  ;;  %v672_v35 = vadd.f32 1.0, %v945_v34 }
 0x297   : > { %v947_v36 = vpop.eup %946 }
 0x298   : > { %960 = vrcp.f32 %v672_v35  ;;  %v673_v37 = vadd.f32 1.0, %v947_v36 }
 0x299   : > { %v949_v38 = vpop.eup %948 }
 0x29a   : > { %690 = vst [vmem:[%s272_s14] sm:$0xff] %v949_v38  ;;  %962 = vrcp.f32 %v673_v37 }
 0x29b   : > { %v951_v39 = vpop.eup %950 }
 0x29c   : > { %691 = vst [vmem:[%s272_s14 + $0x8] sm:$0xff] %v951_v39 }
 0x29d   : > { %v953_v40 = vpop.eup %952 }
 0x29e   : > { %692 = vst [vmem:[%s272_s14 + $0x10] sm:$0xff] %v953_v40 }
 0x29f   : > { %v955_v41 = vpop.eup %954 }
 0x2a0   : > { %693 = vst [vmem:[%s272_s14 + $0x18] sm:$0xff] %v955_v41 }
 0x2a1   : > { %v957_v42 = vpop.eup %956 }
 0x2a2   : > { %694 = vst [vmem:[%s272_s14 + $0x20] sm:$0xff] %v957_v42 }
 0x2a3   : > { %v959_v43 = vpop.eup %958 }
 0x2a4   : > { %695 = vst [vmem:[%s272_s14 + $0x28] sm:$0xff] %v959_v43 }
 0x2a5   : > { %v961_v44 = vpop.eup %960 }
 0x2a6   : > { %696 = vst [vmem:[%s272_s14 + $0x30] sm:$0xff] %v961_v44 }
 0x2a7   : > { %v963_v45 = vpop.eup %962 }
 0x2a8   : > { %697 = vst [vmem:[%s272_s14 + $0x38] sm:$0xff] %v963_v45 }
 0x2a9   : > { %977 = shalt.err (!%p974_p3)
}
 0x2aa   : > { %s978_s29 = scalar_lea.hbm %s1204_s19, 1024  ;;  %s982_s13 = scalar_lea.hbm %s1257_s7, 2048 }
 0x2ab   : > { %p979_p4 = scmp.ne.s32.totalorder %s1204_s19, %s978_s29  ;;  %p983_p9 = scmp.lt.s32.totalorder %s1204_s19, %s1257_s7 }
 0x2ac   : > { %p984_p10 = scmp.lt.s32.totalorder %s982_s13, %s978_s29 }
 0x2ad   : > { %p980_p7 = pnand %p979_p4, %p1108_p5 }
 0x2ae   : > { %p985_p11 = por %p984_p10, %p983_p9 }
 0x2af   : > { %p981_p8 = pneg %p980_p7 }
 0x2b1   : > { %p986_p12 = pnand %p985_p11, %p981_p8 }
 0x2b3   : > { %989 = shalt.err (!%p986_p12)
}
 0x2b4   : > { %s1028_s17 = smov 256   ;;  %s1029_s18 = smov 16  }
 0x2b5   : > { %858 = dma.vmem_to_hbm [thread:$0]  (%p1108_p5), %s1206_s16, 1024, %s1204_s19, %s1210_s20, %s1028_s17, %s1028_s17, %s1029_s18  }
 0x2b6 PF: > { %p864_p13 = scmp.ge.s32.totalorder %s1024_s27, 2  ;;  %s728_s28 = sand.u32 1, %s1012_s24  }
 0x2b7   : > { %s729_s21 = scalar_lea.sflag [#allocation3], %s728_s28 }
 0x2b8   : > { %p861_p0 = pnand %p864_p13, %p1112_p6 }
 0x2ba   : > { %p862_p1 = pneg %p861_p0 }
 0x2bc   : > { %1007 = dma.done.wait (%p862_p1), %s729_s21, 1024  }
 0x2bd   : > { %1009 = vsyncadd (%p862_p1), %s729_s21, 4294966272  ;;  %p17_p2 = scmp.ge.s32.totalorder %s1095_s30, 4   ;;  %s1260_s24 = smov %s1016_s25 }
 0x2be   : > { %s1261_s25 = smov %s1020_s26  ;;  %s1262_s26 = smov %s1106_s10 }
 0x2bf   : > { %s1263_s27 = smov %s1095_s30  ;;  %19 = sbr.rel (!%p17_p2) target bundleno = 3 (0x3), region = 83 }
 0x2c4   :  { %734 = vsyncpa [#allocation3], 1 }
 0x2c5   :  { %736 = vsyncpa [#allocation3 + $0x1], 1 }

</bundles_post_ra>
